<compile_context>
chip_gen: v7x
topology: tpu7x:2x2x1
jax: 0.10.0
libtpu: 0.0.40
codegen_flags: <defaults>
</compile_context>

<pallas_src>
import jax
import jax.numpy as jnp
from jax.experimental import pallas as pl
from jax.experimental.pallas import tpu as pltpu

# Acrobot-v1: observation dim = 6, action dim = 3 (hard-coded; no gym dependency)
N_STATES = 6
N_ACTIONS = 3
N_HIDDEN = 50

# Lane/sublane-dense padded layout used inside the kernel.
S_PAD = 8     # states  6  -> 8   (sublane-friendly K for fc1)
H_PAD = 128   # hidden  50 -> 128 (lane-dense K/N)
A_PAD = 128   # actions 3  -> 128 (lane-dense output -> unmasked vst)

MAX_TILE_B = 512  # batch tile (multiple of 8); weights stay resident across steps


def _round_up(n, m):
    return ((n + m - 1) // m) * m


def net_kernel(x_ref, w1_ref, b1_ref, w2_ref, b2_ref, o_ref):
    # fc1: (TB, S_PAD) @ (S_PAD, H_PAD) + b1, then ReLU
    h = jnp.dot(x_ref[...], w1_ref[...], preferred_element_type=jnp.float32)
    h = jnp.maximum(h + b1_ref[...], 0.0)
    # out: (TB, H_PAD) @ (H_PAD, A_PAD) + b2
    y = jnp.dot(h, w2_ref[...], preferred_element_type=jnp.float32)
    o_ref[...] = (y + b2_ref[...]).astype(o_ref.dtype)


def net_forward(x, w1p, b1p, w2p, b2p):
    """x: (B, N_STATES) f32 (unpadded). Params are the padded layout from pad_params.
    Returns (B, N_ACTIONS) f32 == fc1 -> ReLU -> out of the PyTorch Net."""
    B = x.shape[0]

    # Choose a batch tile (multiple of 8) and pad the batch to a tile multiple.
    tb = min(MAX_TILE_B, _round_up(B, 8))
    b_pad = _round_up(B, tb)
    n_blocks = b_pad // tb

    # Zero-pad x into the lane/sublane-dense layout (zeros are exact: padded
    # state columns hit zero rows of W1, padded hidden/action columns are
    # zeroed in the weights/biases and sliced away below).
    x_pad = jnp.zeros((b_pad, S_PAD), jnp.float32).at[:B, :N_STATES].set(x)

    out_pad = pl.pallas_call(
        net_kernel,
        out_shape=jax.ShapeDtypeStruct((b_pad, A_PAD), jnp.float32),
        grid=(n_blocks,),
        in_specs=[
            # streamed per batch tile
            pl.BlockSpec((tb, S_PAD), lambda i: (i, 0)),
            # weights / biases: constant index_map -> VMEM-resident across steps
            pl.BlockSpec((S_PAD, H_PAD), lambda i: (0, 0)),
            pl.BlockSpec((1, H_PAD), lambda i: (0, 0)),
            pl.BlockSpec((H_PAD, A_PAD), lambda i: (0, 0)),
            pl.BlockSpec((1, A_PAD), lambda i: (0, 0)),
        ],
        out_specs=pl.BlockSpec((tb, A_PAD), lambda i: (i, 0)),
        compiler_params=pltpu.CompilerParams(
            dimension_semantics=("parallel",)),
    )(x_pad, w1p, b1p, w2p, b2p)

    return out_pad[:B, :N_ACTIONS]


def init_params(key):
    """Deterministic init mirroring nn.Linear's U(-1/sqrt(fan_in), 1/sqrt(fan_in)).
    Stored transposed: (in_features, out_features), unpadded."""
    k1, k2, k3, k4 = jax.random.split(key, 4)
    bound1 = 1.0 / jnp.sqrt(jnp.float32(N_STATES))
    bound2 = 1.0 / jnp.sqrt(jnp.float32(N_HIDDEN))
    w1 = jax.random.uniform(k1, (N_STATES, N_HIDDEN), jnp.float32, -bound1, bound1)
    b1 = jax.random.uniform(k2, (1, N_HIDDEN), jnp.float32, -bound1, bound1)
    w2 = jax.random.uniform(k3, (N_HIDDEN, N_ACTIONS), jnp.float32, -bound2, bound2)
    b2 = jax.random.uniform(k4, (1, N_ACTIONS), jnp.float32, -bound2, bound2)
    return w1, b1, w2, b2


def pad_params(w1, b1, w2, b2):
    """One-time host-side zero-padding into the lane-dense kernel layout."""
    w1p = jnp.zeros((S_PAD, H_PAD), jnp.float32).at[:N_STATES, :N_HIDDEN].set(w1)
    b1p = jnp.zeros((1, H_PAD), jnp.float32).at[:, :N_HIDDEN].set(b1)
    w2p = jnp.zeros((H_PAD, A_PAD), jnp.float32).at[:N_HIDDEN, :N_ACTIONS].set(w2)
    b2p = jnp.zeros((1, A_PAD), jnp.float32).at[:, :N_ACTIONS].set(b2)
    return w1p, b1p, w2p, b2p


def reference_forward(x, w1, b1, w2, b2):
    h = jnp.maximum(x @ w1 + b1, 0.0)
    return h @ w2 + b2


if __name__ == "__main__":
    key = jax.random.PRNGKey(0)
    k_params, k_x1, k_x2 = jax.random.split(key, 3)
    w1, b1, w2, b2 = init_params(k_params)
    w1p, b1p, w2p, b2p = pad_params(w1, b1, w2, b2)

    # Small batch (single grid step, tile padded 4 -> 8).
    B_small = 4
    x_small = jax.random.normal(k_x1, (B_small, N_STATES), dtype=jnp.float32)
    out_small = jax.block_until_ready(net_forward(x_small, w1p, b1p, w2p, b2p))
    ref_small = reference_forward(x_small, w1, b1, w2, b2)
    assert out_small.shape == (B_small, N_ACTIONS)
    assert jnp.allclose(out_small, ref_small, atol=1e-5, rtol=1e-5)

    # Larger batch exercising the batch grid (2 tiles of 512) and megacore path.
    B_big = 1024
    x_big = jax.random.normal(k_x2, (B_big, N_STATES), dtype=jnp.float32)
    out_big = jax.block_until_ready(net_forward(x_big, w1p, b1p, w2p, b2p))
    ref_big = reference_forward(x_big, w1, b1, w2, b2)
    assert out_big.shape == (B_big, N_ACTIONS)
    assert jnp.allclose(out_big, ref_big, atol=1e-5, rtol=1e-5)

    print("KERNEL_OK")
</pallas_src>

<mosaic_0001>
module attributes {stable_mosaic.version = 11 : i64} {
  func.func @net_kernel(%arg0: i32, %arg1: memref<8x8xf32, #tpu.memory_space<vmem>>, %arg2: memref<8x128xf32, #tpu.memory_space<vmem>>, %arg3: memref<1x128xf32, #tpu.memory_space<vmem>>, %arg4: memref<128x128xf32, #tpu.memory_space<vmem>>, %arg5: memref<1x128xf32, #tpu.memory_space<vmem>>, %arg6: memref<8x128xf32, #tpu.memory_space<vmem>>) attributes {dimension_semantics = [#tpu.dimension_semantics<parallel>], iteration_bounds = array<i64: 1>, scalar_prefetch = 0 : i64, scratch_operands = 0 : i64, tpu.core_type = #tpu.core_type<tc>, window_params = [{transform_indices = @transform_0, window_bounds = array<i64: 8, 8>}, {pipeline_mode = #tpu.pipeline_mode<synchronous>, transform_indices = @transform_1, window_bounds = array<i64: 8, 128>}, {pipeline_mode = #tpu.pipeline_mode<synchronous>, transform_indices = @transform_2, window_bounds = array<i64: 1, 128>}, {pipeline_mode = #tpu.pipeline_mode<synchronous>, transform_indices = @transform_3, window_bounds = array<i64: 128, 128>}, {pipeline_mode = #tpu.pipeline_mode<synchronous>, transform_indices = @transform_4, window_bounds = array<i64: 1, 128>}, {transform_indices = @transform_5, window_bounds = array<i64: 8, 128>}]} {
    %c0 = arith.constant 0 : index
    %c0_0 = arith.constant 0 : index
    %0 = vector.load %arg1[%c0, %c0_0] : memref<8x8xf32, #tpu.memory_space<vmem>>, vector<8x8xf32>
    %c0_1 = arith.constant 0 : index
    %c0_2 = arith.constant 0 : index
    %1 = vector.load %arg2[%c0_1, %c0_2] : memref<8x128xf32, #tpu.memory_space<vmem>>, vector<8x128xf32>
    %cst = arith.constant dense<0.000000e+00> : vector<8x128xf32>
    %2 = tpu.matmul %0, %1, %cst {dimension_numbers = #tpu.dot_dimension_numbers<[1], [0], [0], [1], [0, 0, 1, 1], [], []>} : vector<8x8xf32>, vector<8x128xf32>, vector<8x128xf32> -> vector<8x128xf32>
    %c0_3 = arith.constant 0 : index
    %c0_4 = arith.constant 0 : index
    %3 = vector.load %arg3[%c0_3, %c0_4] : memref<1x128xf32, #tpu.memory_space<vmem>>, vector<1x128xf32>
    %4 = vector.broadcast %3 : vector<1x128xf32> to vector<8x128xf32>
    %5 = arith.addf %2, %4 : vector<8x128xf32>
    %cst_5 = arith.constant 0.000000e+00 : f32
    %6 = vector.broadcast %cst_5 : f32 to vector<8x128xf32>
    %7 = arith.maximumf %5, %6 : vector<8x128xf32>
    %c0_6 = arith.constant 0 : index
    %c0_7 = arith.constant 0 : index
    %8 = vector.load %arg4[%c0_6, %c0_7] : memref<128x128xf32, #tpu.memory_space<vmem>>, vector<128x128xf32>
    %cst_8 = arith.constant dense<0.000000e+00> : vector<8x128xf32>
    %9 = tpu.matmul %7, %8, %cst_8 {dimension_numbers = #tpu.dot_dimension_numbers<[1], [0], [0], [1], [0, 0, 1, 1], [], []>} : vector<8x128xf32>, vector<128x128xf32>, vector<8x128xf32> -> vector<8x128xf32>
    %c0_9 = arith.constant 0 : index
    %c0_10 = arith.constant 0 : index
    %10 = vector.load %arg5[%c0_9, %c0_10] : memref<1x128xf32, #tpu.memory_space<vmem>>, vector<1x128xf32>
    %11 = vector.broadcast %10 : vector<1x128xf32> to vector<8x128xf32>
    %12 = arith.addf %9, %11 : vector<8x128xf32>
    %c0_11 = arith.constant 0 : index
    %c0_12 = arith.constant 0 : index
    %13 = vector.load %arg6[%c0_11, %c0_12] : memref<8x128xf32, #tpu.memory_space<vmem>>, vector<8x128xf32>
    tpu.vector_store %arg6[%c0_11, %c0_12], %12 {strides = array<i32>} : memref<8x128xf32, #tpu.memory_space<vmem>>, vector<8x128xf32>,
    return
  }
  func.func @transform_0(%arg0: i32) -> (i32, i32) {
    %c0_i32 = arith.constant 0 : i32
    %c0_i32_0 = arith.constant 0 : i32
    return %arg0, %c0_i32 : i32, i32
  }
  func.func @transform_1(%arg0: i32) -> (i32, i32) {
    %c0_i32 = arith.constant 0 : i32
    %c0_i32_0 = arith.constant 0 : i32
    %c0_i32_1 = arith.constant 0 : i32
    return %c0_i32, %c0_i32_0 : i32, i32
  }
  func.func @transform_2(%arg0: i32) -> (i32, i32) {
    %c0_i32 = arith.constant 0 : i32
    %c0_i32_0 = arith.constant 0 : i32
    %c0_i32_1 = arith.constant 0 : i32
    return %c0_i32, %c0_i32_0 : i32, i32
  }
  func.func @transform_3(%arg0: i32) -> (i32, i32) {
    %c0_i32 = arith.constant 0 : i32
    %c0_i32_0 = arith.constant 0 : i32
    %c0_i32_1 = arith.constant 0 : i32
    return %c0_i32, %c0_i32_0 : i32, i32
  }
  func.func @transform_4(%arg0: i32) -> (i32, i32) {
    %c0_i32 = arith.constant 0 : i32
    %c0_i32_0 = arith.constant 0 : i32
    %c0_i32_1 = arith.constant 0 : i32
    return %c0_i32, %c0_i32_0 : i32, i32
  }
  func.func @transform_5(%arg0: i32) -> (i32, i32) {
    %c0_i32 = arith.constant 0 : i32
    %c0_i32_0 = arith.constant 0 : i32
    return %arg0, %c0_i32 : i32, i32
  }
}

</mosaic_0001>

<bundles_post_ra>
// kernel: tpu_custom_call.1
= control target key start
LH: loop header
LB: loop body
LE: loop exit
PB: predicated region body
PF: predicated region fallthrough
CT: control target
= control target key end

     0   :  { %10 = vsyncpa [#allocation3], 0  ;;  %s534_s0 = inlined_call_operand.hbm [shape: f32[8,8], index: 0, kind: input, shape index: {}]   ;;  %s535_s1 = inlined_call_operand.hbm [shape: f32[8,128], index: 1, kind: input, shape index: {}]   ;;  %s536_s2 = inlined_call_operand.vmem [shape: f32[1,128], index: 2, kind: input, shape index: {}]   ;;  %s537_s3 = inlined_call_operand.hbm [shape: f32[128,128], index: 3, kind: input, shape index: {}]   ;;  %s538_s4 = inlined_call_operand.vmem [shape: f32[1,128], index: 4, kind: input, shape index: {}]   ;;  %s539_s5 = inlined_call_operand.hbm [shape: f32[8,128], index: 5, kind: output, shape index: {}]  }
   0x1   :  { %11 = vsyncpa [#allocation6], 0 }
   0x2   :  { %12 = vsyncpa [#allocation4], 0  ;;  %s441_s18 = smov [#allocation5]   ;;  %s442_s20 = smov [#allocation2]  }
   0x3   :  { %s29_s19 = sshll.u32 %s441_s18, 4  ;;  %s19_s21 = sshll.u32 %s442_s20, 4  ;;  %s30_s19 = int_to_ptr.vmem [resolvable:$true] %s29_s19  ;;  %s20_s21 = int_to_ptr.vmem [resolvable:$true] %s19_s21 }
   0x4   :  { %s347_s24 = scalar_lea.hbm %s535_s1, 128 }
   0x5   :  { %p348_p0 = scmp.ne.s32.totalorder %s535_s1, %s347_s24  ;;  %p351_p1 = scmp.lt.u32.totalorder %s347_s24, %s535_s1 }
   0x7   :  { %p353_p2 = pnand %p351_p1, %p348_p0 }
   0x9   :  { %356 = shalt.err (!%p353_p2)
}
   0xa   :  { %s357_s29 = scalar_lea.vmem %s30_s19, 128  ;;  %p362_p4 = scmp.lt.s32.totalorder %s30_s19, %s30_s19 }
   0xb   :  { %p358_p3 = scmp.ne.s32.totalorder %s30_s19, %s357_s29  ;;  %p363_p5 = scmp.lt.s32.totalorder %s357_s29, %s357_s29 }
   0xd   :  { %p364_p6 = por %p363_p5, %p362_p4 }
   0xf   :  { %p365_p7 = pnand %p364_p6, %p358_p3 }
  0x11   :  { %368 = shalt.err (!%p365_p7)
}
  0x12   :  { %32 = dma.hbm_to_vmem [thread:$0]  %s535_s1, 128, %s30_s19, [#allocation6]  }
  0x13   :  { %s369_s9 = scalar_lea.hbm %s534_s0, 128 }
  0x14   :  { %p370_p8 = scmp.ne.s32.totalorder %s534_s0, %s369_s9  ;;  %p373_p9 = scmp.lt.u32.totalorder %s369_s9, %s534_s0 }
  0x16   :  { %p375_p10 = pnand %p373_p9, %p370_p8 }
  0x18   :  { %378 = shalt.err (!%p375_p10)
}
  0x19   :  { %s379_s14 = scalar_lea.vmem %s20_s21, 128  ;;  %p384_p12 = scmp.lt.s32.totalorder %s20_s21, %s20_s21 }
  0x1a   :  { %p380_p11 = scmp.ne.s32.totalorder %s20_s21, %s379_s14  ;;  %p385_p13 = scmp.lt.s32.totalorder %s379_s14, %s379_s14 }
  0x1c   :  { %p386_p0 = por %p385_p13, %p384_p12 }
  0x1e   :  { %p387_p1 = pnand %p386_p0, %p380_p11 }
  0x20   :  { %390 = shalt.err (!%p387_p1)
}
  0x21   :  { %22 = dma.hbm_to_vmem [thread:$0]  %s534_s0, 128, %s20_s21, [#allocation3]  }
  0x22   :  { %s443_s16 = smov [#allocation7]   ;;  %s391_s20 = scalar_lea.hbm %s537_s3, 2048 }
  0x23   :  { %s40_s17 = sshll.u32 %s443_s16, 4  ;;  %p392_p2 = scmp.ne.s32.totalorder %s537_s3, %s391_s20  ;;  %s41_s17 = int_to_ptr.vmem [resolvable:$true] %s40_s17 }
  0x24   :  { %p395_p3 = scmp.lt.u32.totalorder %s391_s20, %s537_s3 }
  0x26   :  { %p397_p4 = pnand %p395_p3, %p392_p2 }
  0x28   :  { %400 = shalt.err (!%p397_p4)
}
  0x29   :  { %s401_s26 = scalar_lea.vmem %s41_s17, 2048  ;;  %p406_p6 = scmp.lt.s32.totalorder %s41_s17, %s41_s17 }
  0x2a   :  { %p402_p5 = scmp.ne.s32.totalorder %s41_s17, %s401_s26  ;;  %p407_p7 = scmp.lt.s32.totalorder %s401_s26, %s401_s26 }
  0x2c   :  { %p408_p8 = por %p407_p7, %p406_p6 }
  0x2e   :  { %p409_p9 = pnand %p408_p8, %p402_p5 }
  0x30   :  { %412 = shalt.err (!%p409_p9)
}
  0x31   :  { %s444_s0 = smov 128   ;;  %s445_s21 = smov 8  }
  0x32   :  { %46 = dma.hbm_to_vmem [thread:$0]  %s537_s3, 2048, %s41_s17, [#allocation6], %s444_s0, %s444_s0, %s445_s21  }
  0x33   :  { %435 = dma.done.wait [#allocation3], 128  }
  0x34   :  { %436 = vsyncadd [#allocation3], 4294967168 }
  0x35   :  { %437 = dma.done.wait [#allocation6], 2176  }
  0x36   :  { %438 = vsyncadd [#allocation6], 4294965120  ;;  %v446_v0 = vmov 0.0   ;;  %vm447_vm0 = vmmov 0   ;;  %v448_v1 = vmov 0.0|0.0   ;;  %vm67_vm1 = vcmask 64512  }
  0x37   :  { %274 = vmatprep.subr.mxu0 %v446_v0  ;;  %276 = vmatprep.mubr.msk.f32.mxu0 %vm447_vm0, %v446_v0  ;;  %v59_v2 = vld [vmem:[#allocation5] sm:$0xff]  ;;  %v58_v3 = vld [vmem:[#allocation2] sm:$0xff]  ;;  %v142_v4 = vld [vmem:[#allocation7] sm:$0xff]  ;;  %s449_s7 = smov [#allocation8]  }
  0x38   :  { %314 = vmatprep.subr.bf16.mxu1 %v448_v1  ;;  %311 = vmatprep.mubr.msk.f32.mxu1 %vm447_vm0, %v446_v0  ;;  %v143_v5 = vld [vmem:[#allocation7 + $0x8] sm:$0xff]  ;;  %v144_v6 = vld [vmem:[#allocation7 + $0x10] sm:$0xff]  ;;  %v145_v7 = vld [vmem:[#allocation7 + $0x18] sm:$0xff]  ;;  %s242_s8 = sshll.u32 %s449_s7, 4  ;;  %s243_s8 = int_to_ptr.vmem [resolvable:$true] %s242_s8 }
  0x39   :  { %275 = vmatpush3.msra.mxu0 %v59_v2  ;;  %v315_v8 = vpack.c.bf16 %v143_v5, %v142_v4  ;;  %v318_v9 = vpack.c.bf16 %v145_v7, %v144_v6  ;;  %v146_v10 = vld [vmem:[#allocation7 + $0x20] sm:$0xff]  ;;  %v147_v11 = vld [vmem:[#allocation7 + $0x28] sm:$0xff]  ;;  %v148_v13 = vld [vmem:[#allocation7 + $0x30] sm:$0xff]  ;;  %s413_s9 = scalar_lea.vmem %s243_s8, 128  ;;  %p418_p11 = scmp.lt.s32.totalorder %s243_s8, %s243_s8 }
  0x3a   :  { %277 = vmatmul.mubr.msk.f32.vlgmr.msra.gmra.mrb[0].mxu0 %vm67_vm1, %v58_v3  ;;  %v321_v12 = vpack.c.bf16 %v147_v11, %v146_v10  ;;  %v149_v14 = vld [vmem:[#allocation7 + $0x38] sm:$0xff]  ;;  %v150_v16 = vld [vmem:[#allocation7 + $0x40] sm:$0xff]  ;;  %v151_v17 = vld [vmem:[#allocation7 + $0x48] sm:$0xff]  ;;  %p414_p10 = scmp.ne.s32.totalorder %s243_s8, %s413_s9  ;;  %p419_p12 = scmp.lt.s32.totalorder %s413_s9, %s413_s9 }
  0x3b   :  { %316 = vmatpush3.bf16.msra.mxu1 %v315_v8  ;;  %v324_v15 = vpack.c.bf16 %v149_v14, %v148_v13  ;;  %v327_v18 = vpack.c.bf16 %v151_v17, %v150_v16  ;;  %v152_v19 = vld [vmem:[#allocation7 + $0x50] sm:$0xff]  ;;  %v153_v20 = vld [vmem:[#allocation7 + $0x58] sm:$0xff]  ;;  %v154_v22 = vld [vmem:[#allocation7 + $0x60] sm:$0xff] }
  0x3c   :  { %317 = vmatprep.subr.bf16.mxu1 %v448_v1  ;;  %v330_v21 = vpack.c.bf16 %v153_v20, %v152_v19  ;;  %v155_v23 = vld [vmem:[#allocation7 + $0x68] sm:$0xff]  ;;  %v156_v25 = vld [vmem:[#allocation7 + $0x70] sm:$0xff]  ;;  %v157_v26 = vld [vmem:[#allocation7 + $0x78] sm:$0xff]  ;;  %p420_p13 = por %p419_p12, %p418_p11 }
  0x3d   :  { %v333_v24 = vpack.c.bf16 %v155_v23, %v154_v22  ;;  %v336_v27 = vpack.c.bf16 %v157_v26, %v156_v25  ;;  %v252_v28 = vld [vmem:[%s536_s2] ss:$0 sm:$0xff] }
  0x3e   :  { %v254_v33 = vld [vmem:[%s538_s4] ss:$0 sm:$0xff]  ;;  %p421_p0 = pnand %p420_p13, %p414_p10 }
  0x3f   :  { %319 = vmatpush3.bf16.msra.mxu1 %v318_v9 }
  0x40   :  { %320 = vmatprep.subr.bf16.mxu1 %v448_v1 }
  0x43   :  { %322 = vmatpush3.bf16.msra.mxu1 %v321_v12 }
  0x44   :  { %323 = vmatprep.subr.bf16.mxu1 %v448_v1 }
  0x47   :  { %325 = vmatpush3.bf16.msra.mxu1 %v324_v15 }
  0x48   :  { %326 = vmatprep.subr.bf16.mxu1 %v448_v1 }
  0x4b   :  { %328 = vmatpush3.bf16.msra.mxu1 %v327_v18 }
  0x4c   :  { %329 = vmatprep.subr.bf16.mxu1 %v448_v1 }
  0x4f   :  { %331 = vmatpush3.bf16.msra.mxu1 %v330_v21 }
  0x50   :  { %332 = vmatprep.subr.bf16.mxu1 %v448_v1 }
  0x53   :  { %334 = vmatpush3.bf16.msra.mxu1 %v333_v24 }
  0x54   :  { %335 = vmatprep.subr.bf16.mxu1 %v448_v1 }
  0x57   :  { %337 = vmatpush3.bf16.msra.mxu1 %v336_v27 }
 0x10d   :  { %v137_v29 = vpop.f32.mrb[0].mxu0 }
 0x10e   :  { %v138_v30 = vadd.f32 %v252_v28, %v137_v29  ;;  %v278_v31 = vpop.f32.mrb[1].mxu0 }
 0x110   :  { %v141_v32 = vmax.f32 %v138_v30, 0.0 }
 0x112   :  { %312 = vmatmul.mubr.f32.vlgmr.msra.gmra.mrb[0].mxu1 %v141_v32 }
 0x1e5   :  { %v231_v34 = vpop.f32.mrb[0].mxu1 }
 0x1e6   :  { %v232_v35 = vadd.f32 %v254_v33, %v231_v34  ;;  %v313_v36 = vpop.f32.mrb[1].mxu1 }
 0x1e8   :  { %235 = vst [vmem:[#allocation8] sm:$0xff] %v232_v35 }
 0x1e9   :  { %424 = shalt.err (!%p421_p0)
}
 0x1ea   :  { %s425_s11 = scalar_lea.hbm %s539_s5, 128 }
 0x1eb   :  { %p426_p1 = scmp.ne.s32.totalorder %s539_s5, %s425_s11  ;;  %p429_p2 = scmp.lt.u32.totalorder %s425_s11, %s539_s5 }
 0x1ed   :  { %p431_p3 = pnand %p429_p2, %p426_p1 }
 0x1ef   :  { %434 = shalt.err (!%p431_p3)
}
 0x1f0   :  { %245 = dma.vmem_to_hbm [thread:$0]  %s243_s8, 128, %s539_s5, [#allocation4]  }
 0x1f1   :  { %439 = dma.done.wait [#allocation4], 128  }
 0x1f2   :  { %440 = vsyncadd [#allocation4], 4294967168 }
 0x1f3   :  { %249 = vsyncpa [#allocation3], 1 }
 0x1f4   :  { %250 = vsyncpa [#allocation6], 1 }
 0x1f5   :  { %251 = vsyncpa [#allocation4], 1 }

</bundles_post_ra>
